<compile_context>
chip_gen: v7x
topology: tpu7x:2x2x1
jax: 0.10.0
libtpu: 0.0.40
codegen_flags: <defaults>
</compile_context>

<pallas_src>
import functools

import jax
import jax.numpy as jnp
from jax.experimental import pallas as pl
from jax.experimental.pallas import tpu as pltpu


def _round_up(n, m):
    return (n + m - 1) // m * m


def gru_cell_kernel(x_ref, h_ref, wx_ref, wh_ref, bx_ref, bh_ref, out_ref, *, hp):
    """One batch tile of the GRU cell.

    x_ref  : [bm, D_in]     input tile
    h_ref  : [bm, Hp]       hidden tile (feature dim padded to Hp)
    wx_ref : [D_in, 3*Hp]   fused x2h weights (gates r|i|n contiguous in lanes)
    wh_ref : [Hp,   3*Hp]   fused h2h weights
    bx_ref : [1, 3*Hp]      x2h bias
    bh_ref : [1, 3*Hp]      h2h bias
    out_ref: [bm, Hp]       new hidden tile
    """
    # Two wide MXU matmuls (instead of six narrow ones), f32 accumulation.
    gx = jnp.dot(x_ref[...], wx_ref[...], preferred_element_type=jnp.float32)
    gx = gx + bx_ref[...].astype(jnp.float32)
    gh = jnp.dot(h_ref[...], wh_ref[...], preferred_element_type=jnp.float32)
    gh = gh + bh_ref[...].astype(jnp.float32)

    # Static, lane-aligned gate slices (hp is a multiple of 128).
    i_r, i_i, i_n = gx[:, :hp], gx[:, hp:2 * hp], gx[:, 2 * hp:]
    h_r, h_i, h_n = gh[:, :hp], gh[:, hp:2 * hp], gh[:, 2 * hp:]

    resetgate = jax.nn.sigmoid(i_r + h_r)
    inputgate = jax.nn.sigmoid(i_i + h_i)
    newgate = jnp.tanh(i_n + resetgate * h_n)

    h = h_ref[...].astype(jnp.float32)
    hy = newgate + inputgate * (h - newgate)
    out_ref[...] = hy.astype(out_ref.dtype)


def prepare_gru_params(w_x2h, b_x2h, w_h2h, b_h2h, dtype=None):
    """One-time re-layout of PyTorch nn.Linear params into kernel form.

    w_x2h : [3H, D_in], b_x2h : [3H], w_h2h : [3H, H], b_h2h : [3H]
    Returns (wx [D_in,3Hp], wh [Hp,3Hp], bx [1,3Hp], bh [1,3Hp]).
    Call this once when parameters are created/updated, NOT per time step.
    """
    three_h, d_in = w_x2h.shape
    H = three_h // 3
    Hp = _round_up(H, 128)  # lane-dense gate width
    dtype = dtype if dtype is not None else w_x2h.dtype

    def pack_w(w, k):
        # [3H, k] -> [3, k, H] -> pad H -> [k, 3*Hp] with gate blocks contiguous.
        w = jnp.transpose(w.reshape(3, H, k), (0, 2, 1))
        w = jnp.pad(w, ((0, 0), (0, 0), (0, Hp - H)))
        return jnp.transpose(w, (1, 0, 2)).reshape(k, 3 * Hp).astype(dtype)

    def pack_b(b):
        b = jnp.pad(b.reshape(3, H), ((0, 0), (0, Hp - H)))
        return b.reshape(1, 3 * Hp).astype(dtype)

    wx = pack_w(w_x2h, d_in)                       # [D_in, 3Hp]
    wh = pack_w(w_h2h, H)                          # [H,    3Hp]
    wh = jnp.pad(wh, ((0, Hp - H), (0, 0)))        # [Hp,   3Hp] (K padded, zeros)
    return wx, wh, pack_b(b_x2h), pack_b(b_h2h)


@jax.jit
def gru_cell_pallas(x, hidden, wx, wh, bx, bh):
    """GRUCell.forward(x, hidden) with pre-packed params.

    x      : [..., input_size]  (flattened to [B, input_size], as in the module)
    hidden : [B, hidden_size]
    wx/wh/bx/bh : outputs of prepare_gru_params
    returns: [B, hidden_size]
    """
    x = x.reshape(-1, x.shape[-1])
    B, d_in = x.shape
    H = hidden.shape[-1]
    Hp = wh.shape[0]
    three_hp = 3 * Hp

    # Pad hidden feature dim to Hp (zeros; padded cols are discarded at the end).
    h = hidden if H == Hp else jnp.pad(hidden, ((0, 0), (0, Hp - H)))

    # Batch tiling: feed the MXU large row tiles (whole batch up to 256 rows).
    if B <= 256:
        block_b = _round_up(B, 8)
        Bp = block_b
    else:
        block_b = 256
        Bp = _round_up(B, 256)
    if Bp != B:
        x = jnp.pad(x, ((0, Bp - B), (0, 0)))
        h = jnp.pad(h, ((0, Bp - B), (0, 0)))

    grid = (Bp // block_b,)

    # Conservative VMEM budget (double-buffered IO + resident weights + f32 temps).
    itemsize = jnp.dtype(x.dtype).itemsize
    vmem_est = (
        2 * itemsize * (block_b * (d_in + 2 * Hp)            # x, h, out tiles
                        + (d_in + Hp) * three_hp + 2 * three_hp)  # weights, biases
        + 2 * 4 * block_b * three_hp                          # f32 gate temporaries
    )
    vmem_limit = min(max(2 * vmem_est, 32 << 20), 64 << 20)

    out = pl.pallas_call(
        functools.partial(gru_cell_kernel, hp=Hp),
        out_shape=jax.ShapeDtypeStruct((Bp, Hp), x.dtype),
        grid_spec=pltpu.PrefetchScalarGridSpec(
            num_scalar_prefetch=0,
            grid=grid,
            in_specs=[
                pl.BlockSpec((block_b, d_in), lambda i: (i, 0)),    # x tile
                pl.BlockSpec((block_b, Hp), lambda i: (i, 0)),      # hidden tile
                pl.BlockSpec((d_in, three_hp), lambda i: (0, 0)),   # wx (resident)
                pl.BlockSpec((Hp, three_hp), lambda i: (0, 0)),     # wh (resident)
                pl.BlockSpec((1, three_hp), lambda i: (0, 0)),      # bx
                pl.BlockSpec((1, three_hp), lambda i: (0, 0)),      # bh
            ],
            out_specs=pl.BlockSpec((block_b, Hp), lambda i: (i, 0)),
        ),
        compiler_params=pltpu.CompilerParams(
            dimension_semantics=("parallel",),
            vmem_limit_bytes=vmem_limit,
        ),
    )(x, h, wx, wh, bx, bh)

    return out[:B, :H]


def gru_cell_reference(x, hidden, w_x2h, b_x2h, w_h2h, b_h2h):
    """Pure-JAX mirror of the PyTorch forward (for correctness checking)."""
    x = x.reshape(-1, x.shape[-1])
    gate_x = x @ w_x2h.T + b_x2h
    gate_h = hidden @ w_h2h.T + b_h2h
    H = hidden.shape[-1]
    i_r, i_i, i_n = gate_x[:, :H], gate_x[:, H:2 * H], gate_x[:, 2 * H:]
    h_r, h_i, h_n = gate_h[:, :H], gate_h[:, H:2 * H], gate_h[:, 2 * H:]
    resetgate = jax.nn.sigmoid(i_r + h_r)
    inputgate = jax.nn.sigmoid(i_i + h_i)
    newgate = jnp.tanh(i_n + resetgate * h_n)
    return newgate + inputgate * (hidden - newgate)


if __name__ == "__main__":
    key = jax.random.PRNGKey(0)
    B, input_size, hidden_size = 8, 16, 32

    k_x, k_h, k_wx, k_bx, k_wh, k_bh = jax.random.split(key, 6)

    # Deterministic uniform(-std, std) init, mirroring GRUCell.reset_parameters.
    std = 1.0 / jnp.sqrt(jnp.float32(hidden_size))
    w_x2h = jax.random.uniform(
        k_wx, (3 * hidden_size, input_size), jnp.float32, -std, std)
    b_x2h = jax.random.uniform(k_bx, (3 * hidden_size,), jnp.float32, -std, std)
    w_h2h = jax.random.uniform(
        k_wh, (3 * hidden_size, hidden_size), jnp.float32, -std, std)
    b_h2h = jax.random.uniform(k_bh, (3 * hidden_size,), jnp.float32, -std, std)

    x = jax.random.normal(k_x, (B, input_size), jnp.float32)
    hidden = jax.random.normal(k_h, (B, hidden_size), jnp.float32)

    # One-time weight re-layout (hoisted out of the per-step path).
    wx, wh, bx, bh = prepare_gru_params(w_x2h, b_x2h, w_h2h, b_h2h)

    hy = gru_cell_pallas(x, hidden, wx, wh, bx, bh)
    hy = jax.block_until_ready(hy)

    hy_ref = gru_cell_reference(x, hidden, w_x2h, b_x2h, w_h2h, b_h2h)
    assert hy.shape == (B, hidden_size)
    assert jnp.allclose(hy, hy_ref, atol=1e-5, rtol=1e-5), "mismatch vs reference"

    print("KERNEL_OK")
</pallas_src>

<mosaic_0001>
module attributes {stable_mosaic.version = 11 : i64} {
  func.func @gru_cell_kernel(%arg0: i32, %arg1: memref<8x16xf32, #tpu.memory_space<vmem>>, %arg2: memref<8x128xf32, #tpu.memory_space<vmem>>, %arg3: memref<16x384xf32, #tpu.memory_space<vmem>>, %arg4: memref<128x384xf32, #tpu.memory_space<vmem>>, %arg5: memref<1x384xf32, #tpu.memory_space<vmem>>, %arg6: memref<1x384xf32, #tpu.memory_space<vmem>>, %arg7: memref<8x128xf32, #tpu.memory_space<vmem>>) attributes {dimension_semantics = [#tpu.dimension_semantics<parallel>], iteration_bounds = array<i64: 1>, scalar_prefetch = 0 : i64, scratch_operands = 0 : i64, tpu.core_type = #tpu.core_type<tc>, window_params = [{transform_indices = @transform_0, window_bounds = array<i64: 8, 16>}, {transform_indices = @transform_1, window_bounds = array<i64: 8, 128>}, {pipeline_mode = #tpu.pipeline_mode<synchronous>, transform_indices = @transform_2, window_bounds = array<i64: 16, 384>}, {pipeline_mode = #tpu.pipeline_mode<synchronous>, transform_indices = @transform_3, window_bounds = array<i64: 128, 384>}, {pipeline_mode = #tpu.pipeline_mode<synchronous>, transform_indices = @transform_4, window_bounds = array<i64: 1, 384>}, {pipeline_mode = #tpu.pipeline_mode<synchronous>, transform_indices = @transform_5, window_bounds = array<i64: 1, 384>}, {transform_indices = @transform_6, window_bounds = array<i64: 8, 128>}]} {
    %c0 = arith.constant 0 : index
    %c0_0 = arith.constant 0 : index
    %0 = vector.load %arg1[%c0, %c0_0] : memref<8x16xf32, #tpu.memory_space<vmem>>, vector<8x16xf32>
    %c0_1 = arith.constant 0 : index
    %c0_2 = arith.constant 0 : index
    %1 = vector.load %arg3[%c0_1, %c0_2] : memref<16x384xf32, #tpu.memory_space<vmem>>, vector<16x384xf32>
    %cst = arith.constant dense<0.000000e+00> : vector<8x384xf32>
    %2 = tpu.matmul %0, %1, %cst {dimension_numbers = #tpu.dot_dimension_numbers<[1], [0], [0], [1], [0, 0, 1, 1], [], []>} : vector<8x16xf32>, vector<16x384xf32>, vector<8x384xf32> -> vector<8x384xf32>
    %c0_3 = arith.constant 0 : index
    %c0_4 = arith.constant 0 : index
    %3 = vector.load %arg5[%c0_3, %c0_4] : memref<1x384xf32, #tpu.memory_space<vmem>>, vector<1x384xf32>
    %4 = vector.broadcast %3 : vector<1x384xf32> to vector<8x384xf32>
    %5 = arith.addf %2, %4 : vector<8x384xf32>
    %c0_5 = arith.constant 0 : index
    %c0_6 = arith.constant 0 : index
    %6 = vector.load %arg2[%c0_5, %c0_6] : memref<8x128xf32, #tpu.memory_space<vmem>>, vector<8x128xf32>
    %c0_7 = arith.constant 0 : index
    %c0_8 = arith.constant 0 : index
    %7 = vector.load %arg4[%c0_7, %c0_8] : memref<128x384xf32, #tpu.memory_space<vmem>>, vector<128x384xf32>
    %cst_9 = arith.constant dense<0.000000e+00> : vector<8x384xf32>
    %8 = tpu.matmul %6, %7, %cst_9 {dimension_numbers = #tpu.dot_dimension_numbers<[1], [0], [0], [1], [0, 0, 1, 1], [], []>} : vector<8x128xf32>, vector<128x384xf32>, vector<8x384xf32> -> vector<8x384xf32>
    %c0_10 = arith.constant 0 : index
    %c0_11 = arith.constant 0 : index
    %9 = vector.load %arg6[%c0_10, %c0_11] : memref<1x384xf32, #tpu.memory_space<vmem>>, vector<1x384xf32>
    %10 = vector.broadcast %9 : vector<1x384xf32> to vector<8x384xf32>
    %11 = arith.addf %8, %10 : vector<8x384xf32>
    %12 = vector.extract_strided_slice %5 {offsets = [0, 0], sizes = [8, 128], strides = [1, 1]} : vector<8x384xf32> to vector<8x128xf32>
    %13 = vector.extract_strided_slice %5 {offsets = [0, 128], sizes = [8, 128], strides = [1, 1]} : vector<8x384xf32> to vector<8x128xf32>
    %14 = vector.extract_strided_slice %5 {offsets = [0, 256], sizes = [8, 128], strides = [1, 1]} : vector<8x384xf32> to vector<8x128xf32>
    %15 = vector.extract_strided_slice %11 {offsets = [0, 0], sizes = [8, 128], strides = [1, 1]} : vector<8x384xf32> to vector<8x128xf32>
    %16 = vector.extract_strided_slice %11 {offsets = [0, 128], sizes = [8, 128], strides = [1, 1]} : vector<8x384xf32> to vector<8x128xf32>
    %17 = vector.extract_strided_slice %11 {offsets = [0, 256], sizes = [8, 128], strides = [1, 1]} : vector<8x384xf32> to vector<8x128xf32>
    %18 = arith.addf %12, %15 : vector<8x128xf32>
    %19 = arith.negf %18 : vector<8x128xf32>
    %20 = math.exp %19 : vector<8x128xf32>
    %cst_12 = arith.constant 1.000000e+00 : f32
    %21 = vector.broadcast %cst_12 : f32 to vector<8x128xf32>
    %22 = arith.addf %21, %20 : vector<8x128xf32>
    %23 = arith.divf %21, %22 : vector<8x128xf32>
    %24 = arith.addf %13, %16 : vector<8x128xf32>
    %25 = arith.negf %24 : vector<8x128xf32>
    %26 = math.exp %25 : vector<8x128xf32>
    %cst_13 = arith.constant 1.000000e+00 : f32
    %27 = vector.broadcast %cst_13 : f32 to vector<8x128xf32>
    %28 = arith.addf %27, %26 : vector<8x128xf32>
    %29 = arith.divf %27, %28 : vector<8x128xf32>
    %30 = arith.mulf %23, %17 : vector<8x128xf32>
    %31 = arith.addf %14, %30 : vector<8x128xf32>
    %32 = math.tanh %31 : vector<8x128xf32>
    %c0_14 = arith.constant 0 : index
    %c0_15 = arith.constant 0 : index
    %33 = vector.load %arg2[%c0_14, %c0_15] : memref<8x128xf32, #tpu.memory_space<vmem>>, vector<8x128xf32>
    %34 = arith.subf %33, %32 : vector<8x128xf32>
    %35 = arith.mulf %29, %34 : vector<8x128xf32>
    %36 = arith.addf %32, %35 : vector<8x128xf32>
    %c0_16 = arith.constant 0 : index
    %c0_17 = arith.constant 0 : index
    %37 = vector.load %arg7[%c0_16, %c0_17] : memref<8x128xf32, #tpu.memory_space<vmem>>, vector<8x128xf32>
    tpu.vector_store %arg7[%c0_16, %c0_17], %36 {strides = array<i32>} : memref<8x128xf32, #tpu.memory_space<vmem>>, vector<8x128xf32>,
    return
  }
  func.func @transform_0(%arg0: i32) -> (i32, i32) {
    %c0_i32 = arith.constant 0 : i32
    %c0_i32_0 = arith.constant 0 : i32
    return %arg0, %c0_i32 : i32, i32
  }
  func.func @transform_1(%arg0: i32) -> (i32, i32) {
    %c0_i32 = arith.constant 0 : i32
    %c0_i32_0 = arith.constant 0 : i32
    return %arg0, %c0_i32 : i32, i32
  }
  func.func @transform_2(%arg0: i32) -> (i32, i32) {
    %c0_i32 = arith.constant 0 : i32
    %c0_i32_0 = arith.constant 0 : i32
    %c0_i32_1 = arith.constant 0 : i32
    return %c0_i32, %c0_i32_0 : i32, i32
  }
  func.func @transform_3(%arg0: i32) -> (i32, i32) {
    %c0_i32 = arith.constant 0 : i32
    %c0_i32_0 = arith.constant 0 : i32
    %c0_i32_1 = arith.constant 0 : i32
    return %c0_i32, %c0_i32_0 : i32, i32
  }
  func.func @transform_4(%arg0: i32) -> (i32, i32) {
    %c0_i32 = arith.constant 0 : i32
    %c0_i32_0 = arith.constant 0 : i32
    %c0_i32_1 = arith.constant 0 : i32
    return %c0_i32, %c0_i32_0 : i32, i32
  }
  func.func @transform_5(%arg0: i32) -> (i32, i32) {
    %c0_i32 = arith.constant 0 : i32
    %c0_i32_0 = arith.constant 0 : i32
    %c0_i32_1 = arith.constant 0 : i32
    return %c0_i32, %c0_i32_0 : i32, i32
  }
  func.func @transform_6(%arg0: i32) -> (i32, i32) {
    %c0_i32 = arith.constant 0 : i32
    %c0_i32_0 = arith.constant 0 : i32
    return %arg0, %c0_i32 : i32, i32
  }
}

</mosaic_0001>

<bundles_post_ra>
// kernel: gru_cell_pallas.1
= control target key start
LH: loop header
LB: loop body
LE: loop exit
PB: predicated region body
PF: predicated region fallthrough
CT: control target
= control target key end

     0   :  { %11 = vsyncpa [#allocation3], 0  ;;  %s798_s0 = inlined_call_operand.vmem [shape: f32[8,16], index: 0, kind: input, shape index: {}]   ;;  %s799_s1 = inlined_call_operand.vmem [shape: f32[8,128], index: 1, kind: input, shape index: {}]   ;;  %s800_s2 = inlined_call_operand.hbm [shape: f32[16,384], index: 2, kind: input, shape index: {}]   ;;  %s801_s3 = inlined_call_operand.hbm [shape: f32[128,384], index: 3, kind: input, shape index: {}]   ;;  %s802_s4 = inlined_call_operand.vmem [shape: f32[1,384], index: 4, kind: input, shape index: {}]   ;;  %s803_s5 = inlined_call_operand.vmem [shape: f32[1,384], index: 5, kind: input, shape index: {}]   ;;  %s804_s6 = inlined_call_operand.hbm [shape: f32[8,128], index: 6, kind: output, shape index: {}]  }
   0x1   :  { %12 = vsyncpa [#allocation6], 0 }
   0x2   :  { %13 = vsyncpa [#allocation4], 0  ;;  %s690_s21 = smov [#allocation2]   ;;  %s618_s25 = scalar_lea.hbm %s800_s2, 768 }
   0x3   :  { %s23_s22 = sshll.u32 %s690_s21, 4  ;;  %p619_p0 = scmp.ne.s32.totalorder %s800_s2, %s618_s25  ;;  %s24_s22 = int_to_ptr.vmem [resolvable:$true] %s23_s22 }
   0x4   :  { %p622_p1 = scmp.lt.u32.totalorder %s618_s25, %s800_s2 }
   0x6   :  { %p624_p2 = pnand %p622_p1, %p619_p0 }
   0x8   :  { %627 = shalt.err (!%p624_p2)
}
   0x9   :  { %s628_s30 = scalar_lea.vmem %s24_s22, 768  ;;  %p633_p4 = scmp.lt.s32.totalorder %s24_s22, %s24_s22 }
   0xa   :  { %p629_p3 = scmp.ne.s32.totalorder %s24_s22, %s628_s30  ;;  %p634_p5 = scmp.lt.s32.totalorder %s628_s30, %s628_s30 }
   0xc   :  { %p635_p6 = por %p634_p5, %p633_p4 }
   0xe   :  { %p636_p7 = pnand %p635_p6, %p629_p3 }
  0x10   :  { %639 = shalt.err (!%p636_p7)
}
  0x11   :  { %s691_s7 = smov 384   ;;  %s692_s8 = smov 24  }
  0x12   :  { %29 = dma.hbm_to_vmem [thread:$0]  %s800_s2, 768, %s24_s22, [#allocation3], %s691_s7, %s691_s7, %s692_s8  }
  0x13   :  { %s693_s11 = smov [#allocation5]   ;;  %s640_s15 = scalar_lea.hbm %s801_s3, 6144 }
  0x14   :  { %s35_s12 = sshll.u32 %s693_s11, 4  ;;  %p641_p8 = scmp.ne.s32.totalorder %s801_s3, %s640_s15  ;;  %s36_s12 = int_to_ptr.vmem [resolvable:$true] %s35_s12 }
  0x15   :  { %p644_p9 = scmp.lt.u32.totalorder %s640_s15, %s801_s3 }
  0x17   :  { %p646_p10 = pnand %p644_p9, %p641_p8 }
  0x19   :  { %649 = shalt.err (!%p646_p10)
}
  0x1a   :  { %s650_s20 = scalar_lea.vmem %s36_s12, 6144  ;;  %p655_p12 = scmp.lt.s32.totalorder %s36_s12, %s36_s12 }
  0x1b   :  { %p651_p11 = scmp.ne.s32.totalorder %s36_s12, %s650_s20  ;;  %p656_p13 = scmp.lt.s32.totalorder %s650_s20, %s650_s20 }
  0x1d   :  { %p657_p0 = por %p656_p13, %p655_p12 }
  0x1f   :  { %p658_p1 = pnand %p657_p0, %p651_p11 }
  0x21   :  { %661 = shalt.err (!%p658_p1)
}
  0x22   :  { %41 = dma.hbm_to_vmem [thread:$0]  %s801_s3, 6144, %s36_s12, [#allocation6], %s691_s7, %s691_s7, %s692_s8  }
  0x23   :  { %684 = dma.done.wait [#allocation3], 768  }
  0x24   :  { %685 = vsyncadd [#allocation3], 4294966528 }
  0x25   :  { %686 = dma.done.wait [#allocation6], 6144  }
  0x26   :  { %687 = vsyncadd [#allocation6], 4294961152  ;;  %v694_v0 = vmov 0.0   ;;  %v695_v1 = vmov 0.0|0.0   ;;  %vm696_vm0 = vmmov 0   ;;  %v54_v2 = vld [vmem:[#allocation2 + $0x8] sm:$0xff] }
  0x27   :  { %144 = vmatprep.mubr.f32.mxu0 %v694_v0  ;;  %535 = vmatprep.subr.bf16.mxu1 %v695_v1  ;;  %v57_v3 = vld [vmem:[#allocation2 + $0x20] sm:$0xff]  ;;  %v56_v6 = vld [vmem:[#allocation2 + $0x18] sm:$0xff]  ;;  %v226_v8 = vld [vmem:[#allocation5 + $0x20] sm:$0xff]  ;;  %vm76_vm1 = vcmask 130048  }
  0x28   :  { %493 = vmatprep.mubr.msk.f32.mxu1 %vm696_vm0, %v694_v0  ;;  %v53_v4 = vld [vmem:[#allocation2] sm:$0xff]  ;;  %v531_v5 = vpack.c.bf16 %v57_v3, %v54_v2  ;;  %v223_v7 = vld [vmem:[#allocation5 + $0x8] sm:$0xff]  ;;  %v222_v11 = vld [vmem:[#allocation5] sm:$0xff] }
  0x29   :  { %v533_v9 = vpack.c.bf16 %v56_v6, %v53_v4  ;;  %v538_v10 = vpack.c.bf16 %v226_v8, %v223_v7  ;;  %v225_v12 = vld [vmem:[#allocation5 + $0x18] sm:$0xff]  ;;  %v232_v14 = vld [vmem:[#allocation5 + $0x50] sm:$0xff]  ;;  %v231_v19 = vld [vmem:[#allocation5 + $0x48] sm:$0xff] }
  0x2a   :  { %532 = vmatprep.subr.bf16.mxu0 %v531_v5  ;;  %v229_v13 = vld [vmem:[#allocation5 + $0x38] sm:$0xff]  ;;  %v52_v15 = vld [vmem:[%s798_s0] sm:$0xff]  ;;  %v540_v16 = vpack.c.bf16 %v225_v12, %v222_v11  ;;  %v235_v20 = vld [vmem:[#allocation5 + $0x68] sm:$0xff] }
  0x2b   :  { %534 = vmatpush1.bf16.msra.mxu0 %v533_v9  ;;  %v542_v17 = vpack.c.bf16 %v232_v14, %v229_v13  ;;  %v228_v18 = vld [vmem:[#allocation5 + $0x30] sm:$0xff]  ;;  %v238_v21 = vld [vmem:[#allocation5 + $0x80] sm:$0xff]  ;;  %v237_v25 = vld [vmem:[#allocation5 + $0x78] sm:$0xff] }
  0x2c   :  { %539 = vmatprep.subr.bf16.mxu0 %v538_v10  ;;  %v544_v22 = vpack.c.bf16 %v231_v19, %v228_v18  ;;  %v546_v23 = vpack.c.bf16 %v238_v21, %v235_v20  ;;  %v234_v24 = vld [vmem:[#allocation5 + $0x60] sm:$0xff]  ;;  %v241_v27 = vld [vmem:[#allocation5 + $0x98] sm:$0xff]  ;;  %v244_v28 = vld [vmem:[#allocation5 + $0xb0] sm:$0xff] }
  0x2d   :  { %v55_v26 = vld [vmem:[#allocation2 + $0x10] sm:$0xff]  ;;  %v58_v29 = vld [vmem:[#allocation2 + $0x28] sm:$0xff]  ;;  %v224_v31 = vld [vmem:[#allocation5 + $0x10] sm:$0xff]  ;;  %v548_v32 = vpack.c.bf16 %v237_v25, %v234_v24  ;;  %v550_v34 = vpack.c.bf16 %v244_v28, %v241_v27  ;;  %v61_v24 = vlaneseq }
  0x2e   :  { %465 = vmatmul.mubr.msk.f32.vlgmr.msra.gmra.mrb[0].mxu0 %vm76_vm1, %v52_v15  ;;  %v536_v30 = vpack.c.bf16 %v58_v29, %v55_v26  ;;  %v227_v33 = vld [vmem:[#allocation5 + $0x28] sm:$0xff]  ;;  %v240_v35 = vld [vmem:[#allocation5 + $0x90] sm:$0xff]  ;;  %v250_v39 = vld [vmem:[#allocation5 + $0xe0] sm:$0xff] }
  0x2f   :  { %541 = vmatpush1.bf16.msra.mxu0 %v540_v16  ;;  %351 = vmatprep.mubr.f32.mxu0 %v694_v0  ;;  %v243_v36 = vld [vmem:[#allocation5 + $0xa8] sm:$0xff]  ;;  %v571_v38 = vpack.c.bf16 %v227_v33, %v224_v31  ;;  %v230_v40 = vld [vmem:[#allocation5 + $0x40] sm:$0xff]  ;;  %v233_v41 = vld [vmem:[#allocation5 + $0x58] sm:$0xff]  ;;  %v62_v25 = vshrl.u32 %v61_v24, 7 }
  0x30   :  { %543 = vmatprep.subr.bf16.mxu0 %v542_v17  ;;  %v247_v37 = vld [vmem:[#allocation5 + $0xc8] sm:$0xff]  ;;  %537 = vmatpush3.bf16.msra.mxu1 %v536_v30  ;;  %v552_v42 = vpack.c.bf16 %v243_v36, %v240_v35  ;;  %v246_v44 = vld [vmem:[#allocation5 + $0xc0] sm:$0xff]  ;;  %v249_v45 = vld [vmem:[#allocation5 + $0xd8] sm:$0xff]  ;;  %v574_v47 = vpack.c.bf16 %v233_v41, %v230_v40 }
  0x31   :  { %570 = vmatprep.subr.bf16.mxu1 %v695_v1  ;;  %v554_v43 = vpack.c.bf16 %v250_v39, %v247_v37  ;;  %v253_v46 = vld [vmem:[#allocation5 + $0xf8] sm:$0xff]  ;;  %v256_v48 = vld [vmem:[#allocation5 + $0x110] sm:$0xff]  ;;  %v239_v50 = vld [vmem:[#allocation5 + $0x88] sm:$0xff]  ;;  %v556_v51 = vpack.c.bf16 %v249_v45, %v246_v44  ;;  %v63_v26 = vsub.s32 0, %v62_v25  ;;  %v71_v45 = vsub.s32 2, %v62_v25 }
  0x32   :  { %v236_v49 = vld [vmem:[#allocation5 + $0x70] sm:$0xff]  ;;  %v558_v52 = vpack.c.bf16 %v256_v48, %v253_v46  ;;  %v255_v54 = vld [vmem:[#allocation5 + $0x108] sm:$0xff]  ;;  %v262_v57 = vld [vmem:[#allocation5 + $0x140] sm:$0xff] }
  0x33   :  { %545 = vmatpush1.bf16.msra.mxu0 %v544_v22  ;;  %494 = vmatmul.mubr.msk.f32.vlgmr.msra.gmra.mrb[0].mxu1 %vm76_vm1, %v52_v15  ;;  %v252_v53 = vld [vmem:[#allocation5 + $0xf0] sm:$0xff]  ;;  %v259_v55 = vld [vmem:[#allocation5 + $0x128] sm:$0xff]  ;;  %v577_v56 = vpack.c.bf16 %v239_v50, %v236_v49  ;;  %v242_v58 = vld [vmem:[#allocation5 + $0xa0] sm:$0xff] }
  0x34   :  { %547 = vmatprep.subr.bf16.mxu0 %v546_v23  ;;  %572 = vmatpush3.bf16.msra.mxu1 %v571_v38  ;;  %v245_v59 = vld [vmem:[#allocation5 + $0xb8] sm:$0xff]  ;;  %v560_v60 = vpack.c.bf16 %v255_v54, %v252_v53  ;;  %v562_v61 = vpack.c.bf16 %v262_v57, %v259_v55  ;;  %v258_v62 = vld [vmem:[#allocation5 + $0x120] sm:$0xff]  ;;  %v268_v3 = vld [vmem:[#allocation5 + $0x170] sm:$0xff] }
  0x35   :  { %573 = vmatprep.subr.bf16.mxu1 %v695_v1  ;;  %528 = vmatprep.mubr.msk.f32.mxu1 %vm696_vm0, %v694_v0  ;;  %v261_v63 = vld [vmem:[#allocation5 + $0x138] sm:$0xff]  ;;  %v580_v2 = vpack.c.bf16 %v245_v59, %v242_v58  ;;  %v248_v4 = vld [vmem:[#allocation5 + $0xd0] sm:$0xff]  ;;  %v251_v5 = vld [vmem:[#allocation5 + $0xe8] sm:$0xff] }
  0x36   :  { %v265_v0 = vld [vmem:[#allocation5 + $0x158] sm:$0xff]  ;;  %v564_v6 = vpack.c.bf16 %v261_v63, %v258_v62  ;;  %v264_v8 = vld [vmem:[#allocation5 + $0x150] sm:$0xff]  ;;  %v267_v9 = vld [vmem:[#allocation5 + $0x168] sm:$0xff]  ;;  %v583_v10 = vpack.c.bf16 %v251_v5, %v248_v4 }
  0x37   :  { %549 = vmatpush1.bf16.msra.mxu0 %v548_v32  ;;  %v566_v7 = vpack.c.bf16 %v268_v3, %v265_v0  ;;  %v254_v11 = vld [vmem:[#allocation5 + $0x100] sm:$0xff]  ;;  %v257_v12 = vld [vmem:[#allocation5 + $0x118] sm:$0xff]  ;;  %v568_v13 = vpack.c.bf16 %v267_v9, %v264_v8  ;;  %v260_v15 = vld [vmem:[#allocation5 + $0x130] sm:$0xff]  ;;  %v67_v32 = vsub.s32 1, %v62_v25 }
  0x38   :  { %551 = vmatprep.subr.bf16.mxu0 %v550_v34  ;;  %575 = vmatpush3.bf16.msra.mxu1 %v574_v47  ;;  %v586_v14 = vpack.c.bf16 %v257_v12, %v254_v11  ;;  %v263_v16 = vld [vmem:[#allocation5 + $0x148] sm:$0xff]  ;;  %v221_v17 = vld [vmem:[%s799_s1] sm:$0xff]  ;;  %v266_v19 = vld [vmem:[#allocation5 + $0x160] sm:$0xff] }
  0x39   :  { %576 = vmatprep.subr.bf16.mxu1 %v695_v1  ;;  %v589_v18 = vpack.c.bf16 %v263_v16, %v260_v15  ;;  %v269_v20 = vld [vmem:[#allocation5 + $0x178] sm:$0xff]  ;;  %v270_v27 = vld [vmem:[%s803_s5] sm:$0x7] }
  0x3a   :  { %v592_v21 = vpack.c.bf16 %v269_v20, %v266_v19  ;;  %v59_v28 = vld [vmem:[%s802_s4] sm:$0x7]  ;;  %v275_v30 = vrot.slane %v270_v27, %v63_v26  ;;  %v279_v35 = vrot.slane %v270_v27, %v67_v32  ;;  %v283_v46 = vrot.slane %v270_v27, %v71_v45  ;;  %s697_s4 = smov [#allocation7]  }
  0x3b   :  { %553 = vmatpush1.bf16.msra.mxu0 %v552_v42  ;;  %v64_v29 = vrot.slane %v59_v28, %v63_v26  ;;  %v68_v34 = vrot.slane %v59_v28, %v67_v32  ;;  %v72_v47 = vrot.slane %v59_v28, %v71_v45  ;;  %s455_s5 = sshll.u32 %s697_s4, 4  ;;  %s456_s5 = int_to_ptr.vmem [resolvable:$true] %s455_s5 }
  0x3c   :  { %555 = vmatprep.subr.bf16.mxu0 %v554_v43  ;;  %578 = vmatpush3.bf16.msra.mxu1 %v577_v56  ;;  %s662_s27 = scalar_lea.vmem %s456_s5, 128  ;;  %p667_p3 = scmp.lt.s32.totalorder %s456_s5, %s456_s5 }
  0x3d   :  { %579 = vmatprep.subr.bf16.mxu1 %v695_v1  ;;  %v594_v31 = vadd.f32 %v275_v30, %v64_v29  ;;  %v596_v38 = vadd.f32 %v279_v35, %v68_v34  ;;  %p663_p2 = scmp.ne.s32.totalorder %s456_s5, %s662_s27  ;;  %p668_p4 = scmp.lt.s32.totalorder %s662_s27, %s662_s27 }
  0x3f   :  { %557 = vmatpush1.bf16.msra.mxu0 %v556_v51  ;;  %p669_p5 = por %p668_p4, %p667_p3 }
  0x40   :  { %559 = vmatprep.subr.bf16.mxu0 %v558_v52  ;;  %581 = vmatpush3.bf16.msra.mxu1 %v580_v2 }
  0x41   :  { %582 = vmatprep.subr.bf16.mxu1 %v695_v1  ;;  %p670_p6 = pnand %p669_p5, %p663_p2 }
  0x43   :  { %561 = vmatpush1.bf16.msra.mxu0 %v560_v60 }
  0x44   :  { %563 = vmatprep.subr.bf16.mxu0 %v562_v61  ;;  %584 = vmatpush3.bf16.msra.mxu1 %v583_v10 }
  0x45   :  { %585 = vmatprep.subr.bf16.mxu1 %v695_v1 }
  0x47   :  { %565 = vmatpush1.bf16.msra.mxu0 %v564_v6 }
  0x48   :  { %567 = vmatprep.subr.bf16.mxu0 %v566_v7  ;;  %587 = vmatpush3.bf16.msra.mxu1 %v586_v14 }
  0x49   :  { %588 = vmatprep.subr.bf16.mxu1 %v695_v1 }
  0x4b   :  { %569 = vmatpush1.bf16.msra.mxu0 %v568_v13 }
  0x4c   :  { %590 = vmatpush3.bf16.msra.mxu1 %v589_v18 }
  0x4d   :  { %591 = vmatprep.subr.bf16.mxu1 %v695_v1 }
  0x4e   :  { %352 = vmatmul.mubr.f32.vlgmr.msra.gmra.mrb[0].mxu0 %v221_v17 }
  0x50   :  { %593 = vmatpush3.bf16.msra.mxu1 %v592_v21 }
  0x53   :  { %529 = vmatmul.mubr.f32.vlgmr.msra.gmra.mrb[2].mxu1 %v221_v17 }
 0x106   :  { %v217_v22 = vpop.f32.mrb[0].mxu1 }
 0x107   :  { %v495_v23 = vpop.f32.mrb[1].mxu1  ;;  %v218_v51 = vadd.f32 %v217_v22, %v72_v47 }
 0x121   :  { %v353_v1 = vpop.f32.mrb[0].mxu0 }
 0x122   :  { %v595_v33 = vadd.f32 %v594_v31, %v353_v1  ;;  %v355_v36 = vpop.f32.mrb[1].mxu0 }
 0x123   :  { %v597_v39 = vadd.f32 %v596_v38, %v355_v36 }
 0x124   :  { %v467_v37 = vmul.f32 -1.442695, %v595_v33 }
 0x125   :  { %v468_v42 = vmul.f32 -1.442695, %v597_v39 }
 0x126   :  { %608 = vpow2.f32 %v467_v37  ;;  %v424_v40 = vpop.f32.mrb[2].mxu1 }
 0x127   :  { %v530_v41 = vpop.f32.mrb[3].mxu1  ;;  %610 = vpow2.f32 %v468_v42  ;;  %v425_v48 = vadd.f32 %v424_v40, %v283_v46 }
 0x130   :  { %v609_v43 = vpop.eup %608 }
 0x131   :  { %v432_v44 = vadd.f32 1.0, %v609_v43  ;;  %v611_v49 = vpop.eup %610 }
 0x132   :  { %v439_v53 = vadd.f32 1.0, %v611_v49 }
 0x133   :  { %612 = vrcp.f32 %v432_v44 }
 0x13d   :  { %v613_v50 = vpop.eup %612 }
 0x13e   :  { %v442_v52 = vmul.f32 %v613_v50, %v425_v48 }
 0x140   :  { %v443_v54 = vadd.f32 %v442_v52, %v218_v51 }
 0x142   :  { %614 = vtanh.f32 %v443_v54 }
 0x143   :  { %616 = vrcp.f32 %v439_v53 }
 0x14c   :  { %v615_v55 = vpop.eup %614 }
 0x14d   :  { %v445_v56 = vsub.f32 %v221_v17, %v615_v55  ;;  %v617_v57 = vpop.eup %616 }
 0x14f   :  { %v446_v58 = vmul.f32 %v617_v57, %v445_v56 }
 0x151   :  { %v447_v59 = vadd.f32 %v615_v55, %v446_v58 }
 0x153   :  { %448 = vst [vmem:[#allocation7] sm:$0xff] %v447_v59 }
 0x154   :  { %673 = shalt.err (!%p670_p6)
}
 0x155   :  { %s674_s30 = scalar_lea.hbm %s804_s6, 128 }
 0x156   :  { %p675_p7 = scmp.ne.s32.totalorder %s804_s6, %s674_s30  ;;  %p678_p8 = scmp.lt.u32.totalorder %s674_s30, %s804_s6 }
 0x158   :  { %p680_p9 = pnand %p678_p8, %p675_p7 }
 0x15a   :  { %683 = shalt.err (!%p680_p9)
}
 0x15b   :  { %458 = dma.vmem_to_hbm [thread:$0]  %s456_s5, 128, %s804_s6, [#allocation4]  }
 0x15c   :  { %688 = dma.done.wait [#allocation4], 128  }
 0x15d   :  { %689 = vsyncadd [#allocation4], 4294967168 }
 0x15e   :  { %462 = vsyncpa [#allocation3], 1 }
 0x15f   :  { %463 = vsyncpa [#allocation6], 1 }
 0x160   :  { %464 = vsyncpa [#allocation4], 1 }

</bundles_post_ra>
